<compile_context>
chip_gen: v6e
topology: v6e:2x2x1
jax: 0.10.0
libtpu: 0.0.40
codegen_flags: <defaults>
</compile_context>

<pallas_src>
import jax
import jax.numpy as jnp
from jax.experimental import pallas as pl
from jax.experimental.pallas import tpu as pltpu

_SAMPLES_PER_ROW = 16     # 16 samples x 8 features = 128 lanes per row
_FEATURES = 8
_HIDDEN = 4


def _sigmoid(v):
    # sigmoid(v) = 0.5 * (tanh(v/2) + 1): a single native EUP transcendental
    # per element (keeps the divide of 1/(1+exp(-v)) off the VPU slots).
    return 0.5 * jnp.tanh(0.5 * v) + 0.5


def _logreg_kernel(w1_ref, b1_ref, w2_ref, b2_ref, x_ref, o_ref):
    """One batch tile of the 2-layer sigmoid MLP, batch in natural layout.

    Shapes:
      w1_ref: (128, 64) f32 VMEM, resident (block-diagonal copies of w1.T)
      b1_ref: (1, 64)   f32 VMEM, resident (layer-1 bias tiled 16x)
      w2_ref: (64, 16)  f32 VMEM, resident (block-diagonal copies of w2)
      b2_ref: (1,)      f32 SMEM scalar
      x_ref : (R, 128)  VMEM input tile: lane l = 8*sample_slot + feature
      o_ref : (R, 16)   VMEM output tile: lane t = sample_slot
    """
    x = x_ref[...].astype(jnp.float32)                               # (R, 128)
    # Layer 1: block-diagonal matmul de-interleaves the 16 samples per row
    # and computes all 4 hidden pre-activations at once (otherwise-idle MXU).
    h = jnp.dot(x, w1_ref[...], preferred_element_type=jnp.float32)  # (R, 64)
    h = _sigmoid(h + b1_ref[...])
    # Layer 2: second block-diagonal matmul -> one logit lane per sample.
    y = jnp.dot(h, w2_ref[...], preferred_element_type=jnp.float32)  # (R, 16)
    o_ref[...] = _sigmoid(y + b2_ref[0]).astype(o_ref.dtype)


def logistic_regression_forward(x, w1, b1, w2, b2, *, tile_samples=262144):
    """x: (B, 8); w1: (4, 8); b1: (4,); w2: (1, 4); b2: (1,).  Returns (B, 1).

    x may be float32 or bfloat16; it is streamed to the kernel in whatever
    float dtype it arrives in (no wrapper-side cast / transpose / relayout)
    and upcast to f32 inside the kernel.  The output matches x's dtype.
    """
    x = jnp.asarray(x)
    if not jnp.issubdtype(x.dtype, jnp.floating):
        x = x.astype(jnp.float32)
    B = x.shape[0]
    assert x.shape[1] == _FEATURES, x.shape

    # Natural-layout streaming: (B, 8) -> (rows, 128) is a free row-major
    # reshape (no transpose, no copy) whenever B % 16 == 0.
    rows = -(-B // _SAMPLES_PER_ROW)
    Bp = rows * _SAMPLES_PER_ROW
    if Bp != B:
        # TODO(synk): ragged batches still pay one pad copy; hand over
        # B % 16 == 0 upstream to stay copy-free end to end.
        x = jnp.pad(x, ((0, Bp - B), (0, 0)))
    x2d = x.reshape(rows, _SAMPLES_PER_ROW * _FEATURES)          # (rows, 128)

    # Tile: default 256K samples/step (16K rows) -> 2 x 8 MiB f32 input
    # buffers + 2 x 1 MiB output buffers, under the 32 MiB VMEM limit
    # (v7x-safe).  Clamp so large batches still get >= ~8 grid steps
    # (megacore sharding on v7x, >= 2 in-flight DMAs per core).
    r_cap = max(16, (tile_samples // _SAMPLES_PER_ROW) // 16 * 16)
    r_tgt = max(16, ((-(-rows // 8)) + 15) // 16 * 16)
    R = min(r_cap, r_tgt)
    if R >= rows:
        R = rows                      # single full-extent block (always legal)
    grid = (-(-rows // R),)           # ragged last block is handled by Pallas

    # Parameters: PyTorch (out, in) layout -> tiny block-diagonal matrices
    # (VMEM-resident via constant index_map; DMA'd once).
    w1f = jnp.asarray(w1, jnp.float32)                           # (4, 8)
    b1f = jnp.asarray(b1, jnp.float32).reshape(_HIDDEN)
    w2f = jnp.asarray(w2, jnp.float32).reshape(_HIDDEN)
    b2f = jnp.asarray(b2, jnp.float32).reshape(1)
    eye = jnp.eye(_SAMPLES_PER_ROW, dtype=jnp.float32)
    # W1_big[8s+i, 4t+f] = (s==t) * w1[f, i]
    w1_big = jnp.einsum("st,fi->sitf", eye, w1f).reshape(128, 64)
    b1_big = jnp.tile(b1f, _SAMPLES_PER_ROW).reshape(1, 64)
    # W2_big[4s+f, t]    = (s==t) * w2[f]
    w2_big = jnp.einsum("st,f->sft", eye, w2f).reshape(64, 16)

    out2d = pl.pallas_call(
        _logreg_kernel,
        out_shape=jax.ShapeDtypeStruct((rows, _SAMPLES_PER_ROW), x.dtype),
        grid=grid,
        in_specs=[
            pl.BlockSpec((128, 64), lambda i: (0, 0)),           # w1_big
            pl.BlockSpec((1, 64), lambda i: (0, 0)),             # b1_big
            pl.BlockSpec((64, 16), lambda i: (0, 0)),            # w2_big
            pl.BlockSpec(memory_space=pltpu.MemorySpace.SMEM),   # b2 scalar
            pl.BlockSpec((R, 128), lambda i: (i, 0)),            # x stream
        ],
        out_specs=pl.BlockSpec((R, _SAMPLES_PER_ROW), lambda i: (i, 0)),
        compiler_params=pltpu.CompilerParams(
            dimension_semantics=("parallel",),   # megacore split on v7x
            vmem_limit_bytes=32 * 1024 * 1024,   # TODO(synk): on v5e/v6e only,
                                                 # raise to 48-64 MiB + bigger
                                                 # tile (128 MiB physical VMEM).
        ),
    )(w1_big, b1_big, w2_big, b2f, x2d)

    y = out2d.reshape(Bp)                 # free row-major reshape
    if Bp != B:
        y = y[:B]                         # only ragged batches pay this copy
    return y.reshape(B, 1)


def _reference_forward(x, w1, b1, w2, b2):
    h = jax.nn.sigmoid(x @ w1.T + b1)
    return jax.nn.sigmoid(h @ w2.T + b2)


if __name__ == "__main__":
    key = jax.random.PRNGKey(0)
    k_x, k_w1, k_b1, k_w2, k_b2 = jax.random.split(key, 5)

    # Deterministic PyTorch-Linear-like fan-in init.
    w1 = jax.random.uniform(k_w1, (4, 8), jnp.float32, -0.35, 0.35)
    b1 = jax.random.uniform(k_b1, (4,), jnp.float32, -0.35, 0.35)
    w2 = jax.random.uniform(k_w2, (1, 4), jnp.float32, -0.5, 0.5)
    b2 = jax.random.uniform(k_b2, (1,), jnp.float32, -0.5, 0.5)

    # 1) Small-batch float32 check (single block, ragged B).
    batch = 8
    x = jax.random.normal(k_x, (batch, 8), dtype=jnp.float32)
    out = jax.block_until_ready(logistic_regression_forward(x, w1, b1, w2, b2))
    ref = _reference_forward(x, w1, b1, w2, b2)
    assert out.shape == (batch, 1), out.shape
    assert jnp.allclose(out, ref, atol=5e-3, rtol=5e-3), (out, ref)

    # 2) Multi-block + ragged-tail float32 check (forces several grid steps).
    batch2 = 1000
    x2 = jax.random.normal(k_x, (batch2, 8), dtype=jnp.float32)
    out2 = jax.block_until_ready(
        logistic_regression_forward(x2, w1, b1, w2, b2, tile_samples=256))
    ref2 = _reference_forward(x2, w1, b1, w2, b2)
    assert out2.shape == (batch2, 1), out2.shape
    assert jnp.allclose(out2, ref2, atol=5e-3, rtol=5e-3)

    # 3) bfloat16 streaming path (halved HBM traffic; compute stays f32).
    x_bf16 = x2.astype(jnp.bfloat16)
    out_bf = jax.block_until_ready(
        logistic_regression_forward(x_bf16, w1, b1, w2, b2))
    ref_bf = _reference_forward(x_bf16.astype(jnp.float32), w1, b1, w2, b2)
    assert out_bf.shape == (batch2, 1), out_bf.shape
    assert jnp.allclose(out_bf.astype(jnp.float32), ref_bf, atol=2e-2, rtol=2e-2)

    print("KERNEL_OK")
</pallas_src>

<mosaic_0001>
module attributes {stable_mosaic.version = 11 : i64} {
  func.func @_logreg_kernel(%arg0: i32, %arg1: memref<128x64xf32, #tpu.memory_space<vmem>>, %arg2: memref<1x64xf32, #tpu.memory_space<vmem>>, %arg3: memref<64x16xf32, #tpu.memory_space<vmem>>, %arg4: memref<1xf32, #tpu.memory_space<smem>>, %arg5: memref<1x128xf32, #tpu.memory_space<vmem>>, %arg6: memref<1x16xf32, #tpu.memory_space<vmem>>) attributes {dimension_semantics = [#tpu.dimension_semantics<parallel>], iteration_bounds = array<i64: 1>, scalar_prefetch = 0 : i64, scratch_operands = 0 : i64, tpu.core_type = #tpu.core_type<tc>, window_params = [{pipeline_mode = #tpu.pipeline_mode<synchronous>, transform_indices = @transform_0, window_bounds = array<i64: 128, 64>}, {pipeline_mode = #tpu.pipeline_mode<synchronous>, transform_indices = @transform_1, window_bounds = array<i64: 1, 64>}, {pipeline_mode = #tpu.pipeline_mode<synchronous>, transform_indices = @transform_2, window_bounds = array<i64: 64, 16>}, {transform_indices = @transform_3, window_bounds = array<i64: 1>}, {transform_indices = @transform_4, window_bounds = array<i64: 1, 128>}, {transform_indices = @transform_5, window_bounds = array<i64: 1, 16>}]} {
    %c0 = arith.constant 0 : index
    %c0_0 = arith.constant 0 : index
    %0 = vector.load %arg5[%c0, %c0_0] : memref<1x128xf32, #tpu.memory_space<vmem>>, vector<1x128xf32>
    %c0_1 = arith.constant 0 : index
    %c0_2 = arith.constant 0 : index
    %1 = vector.load %arg1[%c0_1, %c0_2] : memref<128x64xf32, #tpu.memory_space<vmem>>, vector<128x64xf32>
    %cst = arith.constant dense<0.000000e+00> : vector<1x64xf32>
    %2 = tpu.matmul %0, %1, %cst {dimension_numbers = #tpu.dot_dimension_numbers<[1], [0], [0], [1], [0, 0, 1, 1], [], []>} : vector<1x128xf32>, vector<128x64xf32>, vector<1x64xf32> -> vector<1x64xf32>
    %c0_3 = arith.constant 0 : index
    %c0_4 = arith.constant 0 : index
    %3 = vector.load %arg2[%c0_3, %c0_4] : memref<1x64xf32, #tpu.memory_space<vmem>>, vector<1x64xf32>
    %4 = arith.addf %2, %3 : vector<1x64xf32>
    %cst_5 = arith.constant 5.000000e-01 : f32
    %5 = vector.broadcast %cst_5 : f32 to vector<1x64xf32>
    %6 = arith.mulf %5, %4 : vector<1x64xf32>
    %7 = math.tanh %6 : vector<1x64xf32>
    %cst_6 = arith.constant 5.000000e-01 : f32
    %8 = vector.broadcast %cst_6 : f32 to vector<1x64xf32>
    %9 = arith.mulf %8, %7 : vector<1x64xf32>
    %cst_7 = arith.constant 5.000000e-01 : f32
    %10 = vector.broadcast %cst_7 : f32 to vector<1x64xf32>
    %11 = arith.addf %9, %10 : vector<1x64xf32>
    %c0_8 = arith.constant 0 : index
    %c0_9 = arith.constant 0 : index
    %12 = vector.load %arg3[%c0_8, %c0_9] : memref<64x16xf32, #tpu.memory_space<vmem>>, vector<64x16xf32>
    %cst_10 = arith.constant dense<0.000000e+00> : vector<1x16xf32>
    %13 = tpu.matmul %11, %12, %cst_10 {dimension_numbers = #tpu.dot_dimension_numbers<[1], [0], [0], [1], [0, 0, 1, 1], [], []>} : vector<1x64xf32>, vector<64x16xf32>, vector<1x16xf32> -> vector<1x16xf32>
    %c0_11 = arith.constant 0 : index
    %14 = memref.load %arg4[%c0_11] : memref<1xf32, #tpu.memory_space<smem>>
    %15 = vector.broadcast %14 : f32 to vector<1x16xf32>
    %16 = arith.addf %13, %15 : vector<1x16xf32>
    %cst_12 = arith.constant 5.000000e-01 : f32
    %17 = vector.broadcast %cst_12 : f32 to vector<1x16xf32>
    %18 = arith.mulf %17, %16 : vector<1x16xf32>
    %19 = math.tanh %18 : vector<1x16xf32>
    %cst_13 = arith.constant 5.000000e-01 : f32
    %20 = vector.broadcast %cst_13 : f32 to vector<1x16xf32>
    %21 = arith.mulf %20, %19 : vector<1x16xf32>
    %cst_14 = arith.constant 5.000000e-01 : f32
    %22 = vector.broadcast %cst_14 : f32 to vector<1x16xf32>
    %23 = arith.addf %21, %22 : vector<1x16xf32>
    %c0_15 = arith.constant 0 : index
    %c0_16 = arith.constant 0 : index
    %24 = vector.load %arg6[%c0_15, %c0_16] : memref<1x16xf32, #tpu.memory_space<vmem>>, vector<1x16xf32>
    tpu.vector_store %arg6[%c0_15, %c0_16], %23 {strides = array<i32>} : memref<1x16xf32, #tpu.memory_space<vmem>>, vector<1x16xf32>,
    return
  }
  func.func @transform_0(%arg0: i32) -> (i32, i32) {
    %c0_i32 = arith.constant 0 : i32
    %c0_i32_0 = arith.constant 0 : i32
    %c0_i32_1 = arith.constant 0 : i32
    return %c0_i32, %c0_i32_0 : i32, i32
  }
  func.func @transform_1(%arg0: i32) -> (i32, i32) {
    %c0_i32 = arith.constant 0 : i32
    %c0_i32_0 = arith.constant 0 : i32
    %c0_i32_1 = arith.constant 0 : i32
    return %c0_i32, %c0_i32_0 : i32, i32
  }
  func.func @transform_2(%arg0: i32) -> (i32, i32) {
    %c0_i32 = arith.constant 0 : i32
    %c0_i32_0 = arith.constant 0 : i32
    %c0_i32_1 = arith.constant 0 : i32
    return %c0_i32, %c0_i32_0 : i32, i32
  }
  func.func @transform_3(%arg0: i32) -> i32 {
    %c0_i32 = arith.constant 0 : i32
    %c0_i32_0 = arith.constant 0 : i32
    return %c0_i32 : i32
  }
  func.func @transform_4(%arg0: i32) -> (i32, i32) {
    %c0_i32 = arith.constant 0 : i32
    %c0_i32_0 = arith.constant 0 : i32
    return %arg0, %c0_i32 : i32, i32
  }
  func.func @transform_5(%arg0: i32) -> (i32, i32) {
    %c0_i32 = arith.constant 0 : i32
    %c0_i32_0 = arith.constant 0 : i32
    return %arg0, %c0_i32 : i32, i32
  }
}

</mosaic_0001>

<bundles_post_ra>
// kernel: tpu_custom_call.1
= control target key start
LH: loop header
LB: loop body
LE: loop exit
PB: predicated region body
PF: predicated region fallthrough
CT: control target
= control target key end

     0   :  { %v328_v1 = vmov 0.0   ;;  %vm329_vm0 = vmmov 0   ;;  %s471_s0 = inlined_call_operand.vmem [shape: f32[128,64], index: 0, kind: input, shape index: {}]   ;;  %s472_s1 = inlined_call_operand.vmem [shape: f32[1,64], index: 1, kind: input, shape index: {}]   ;;  %s473_s2 = inlined_call_operand.vmem [shape: f32[64,16], index: 2, kind: input, shape index: {}]   ;;  %s474_s3 = inlined_call_operand.<no memory space> [shape: f32[1], index: 3, kind: input, shape index: {}]   ;;  %s475_s4 = inlined_call_operand.vmem [shape: f32[1,128], index: 4, kind: input, shape index: {}]   ;;  %s476_s5 = inlined_call_operand.hbm [shape: f32[1,16], index: 5, kind: output, shape index: {}]  }
   0x1   :  { %v38_v0 = vld [vmem:[%s471_s0 + $0x78] sm:$0xff]  ;;  %245 = vmatprep.subr.mxu0 %v328_v1  ;;  %v37_v2 = vld [vmem:[%s471_s0 + $0x70] sm:$0xff]  ;;  %277 = vmatprep.mubr.msk.f32.mxu0 %vm329_vm0, %v328_v1  ;;  %v36_v3 = vld [vmem:[%s471_s0 + $0x68] sm:$0xff] }
   0x2   :  { %246 = vmatpush3.msra.mxu0 %v38_v0  ;;  %280 = vmatprep.subr.mxu1 %v328_v1  ;;  %v35_v4 = vld [vmem:[%s471_s0 + $0x60] sm:$0xff] }
   0x3   :  { %247 = vmatprep.subr.mxu0 %v328_v1  ;;  %296 = vmatprep.mubr.msk.f32.mxu1 %vm329_vm0, %v328_v1 }
   0x4   :  { %248 = vmatpush3.msra.mxu0 %v37_v2 }
   0x5   :  { %249 = vmatprep.subr.mxu0 %v328_v1 }
   0x6   :  { %250 = vmatpush3.msra.mxu0 %v36_v3 }
   0x7   :  { %11 = vsyncpa [#allocation4], 0  ;;  %251 = vmatprep.subr.mxu0 %v328_v1  ;;  %v34_v5 = vld [vmem:[%s471_s0 + $0x58] sm:$0xff]  ;;  %v33_v6 = vld [vmem:[%s471_s0 + $0x50] sm:$0xff]  ;;  %vm124_vm1 = vcmask 523264   ;;  %v123_v34 = vstv %s474_s3  ;;  %vm202_vm2 = vcmask 122880  }
   0x8   :  { %252 = vmatpush3.msra.mxu0 %v35_v4  ;;  %v32_v7 = vld [vmem:[%s471_s0 + $0x48] sm:$0xff]  ;;  %v31_v8 = vld [vmem:[%s471_s0 + $0x40] sm:$0xff]  ;;  %v30_v9 = vld [vmem:[%s471_s0 + $0x38] sm:$0xff] }
   0x9   :  { %253 = vmatprep.subr.mxu0 %v328_v1  ;;  %v29_v10 = vld [vmem:[%s471_s0 + $0x30] sm:$0xff]  ;;  %v28_v11 = vld [vmem:[%s471_s0 + $0x28] sm:$0xff]  ;;  %v27_v12 = vld [vmem:[%s471_s0 + $0x20] sm:$0xff] }
   0xa   :  { %254 = vmatpush3.msra.mxu0 %v34_v5  ;;  %v26_v13 = vld [vmem:[%s471_s0 + $0x18] sm:$0xff]  ;;  %v25_v14 = vld [vmem:[%s471_s0 + $0x10] sm:$0xff]  ;;  %v24_v15 = vld [vmem:[%s471_s0 + $0x8] sm:$0xff] }
   0xb   :  { %255 = vmatprep.subr.mxu0 %v328_v1  ;;  %v23_v16 = vld [vmem:[%s471_s0] sm:$0xff]  ;;  %v121_v18 = vld [vmem:[%s473_s2 + $0x38] sm:$0xff]  ;;  %v120_v19 = vld [vmem:[%s473_s2 + $0x30] sm:$0xff] }
   0xc   :  { %256 = vmatpush3.msra.mxu0 %v33_v6  ;;  %v22_v17 = vld [vmem:[%s475_s4] sm:$0x1]  ;;  %281 = vmatpush3.msra.mxu1 %v121_v18  ;;  %v119_v20 = vld [vmem:[%s473_s2 + $0x28] sm:$0xff]  ;;  %v117_v22 = vld [vmem:[%s473_s2 + $0x18] sm:$0xff] }
   0xd   :  { %257 = vmatprep.subr.mxu0 %v328_v1  ;;  %282 = vmatprep.subr.mxu1 %v328_v1  ;;  %v118_v21 = vld [vmem:[%s473_s2 + $0x20] sm:$0xff]  ;;  %v116_v23 = vld [vmem:[%s473_s2 + $0x10] sm:$0xff]  ;;  %v115_v24 = vld [vmem:[%s473_s2 + $0x8] sm:$0xff] }
   0xe   :  { %258 = vmatpush3.msra.mxu0 %v32_v7  ;;  %283 = vmatpush3.msra.mxu1 %v120_v19  ;;  %v114_v25 = vld [vmem:[%s473_s2] sm:$0xff] }
   0xf   :  { %259 = vmatprep.subr.mxu0 %v328_v1  ;;  %284 = vmatprep.subr.mxu1 %v328_v1  ;;  %v39_v26 = vld [vmem:[%s472_s1] sm:$0x1]  ;;  %s330_s1 = smov [#allocation3]  }
  0x10   :  { %260 = vmatpush3.msra.mxu0 %v31_v8  ;;  %285 = vmatpush3.msra.mxu1 %v119_v20  ;;  %s210_s2 = sshll.u32 %s330_s1, 4  ;;  %s211_s2 = int_to_ptr.vmem [resolvable:$true] %s210_s2 }
  0x11   :  { %261 = vmatprep.subr.mxu0 %v328_v1  ;;  %286 = vmatprep.subr.mxu1 %v328_v1  ;;  %s306_s20 = scalar_lea.vmem %s211_s2, 16  ;;  %s310_s21 = scalar_lea.vmem %s211_s2, 32 }
  0x12   :  { %262 = vmatpush3.msra.mxu0 %v30_v9  ;;  %287 = vmatpush3.msra.mxu1 %v118_v21  ;;  %p307_p0 = scmp.ne.s32.totalorder %s211_s2, %s306_s20  ;;  %p311_p1 = scmp.lt.s32.totalorder %s211_s2, %s211_s2 }
  0x13   :  { %263 = vmatprep.subr.mxu0 %v328_v1  ;;  %288 = vmatprep.subr.mxu1 %v328_v1  ;;  %p312_p2 = scmp.lt.s32.totalorder %s310_s21, %s306_s20 }
  0x14   :  { %264 = vmatpush3.msra.mxu0 %v29_v10  ;;  %289 = vmatpush3.msra.mxu1 %v117_v22 }
  0x15   :  { %265 = vmatprep.subr.mxu0 %v328_v1  ;;  %290 = vmatprep.subr.mxu1 %v328_v1  ;;  %p313_p3 = por %p312_p2, %p311_p1 }
  0x16   :  { %266 = vmatpush3.msra.mxu0 %v28_v11  ;;  %291 = vmatpush3.msra.mxu1 %v116_v23 }
  0x17   :  { %267 = vmatprep.subr.mxu0 %v328_v1  ;;  %292 = vmatprep.subr.mxu1 %v328_v1  ;;  %p314_p4 = pnand %p313_p3, %p307_p0 }
  0x18   :  { %268 = vmatpush3.msra.mxu0 %v27_v12  ;;  %293 = vmatpush3.msra.mxu1 %v115_v24 }
  0x19   :  { %269 = vmatprep.subr.mxu0 %v328_v1  ;;  %294 = vmatprep.subr.mxu1 %v328_v1 }
  0x1a   :  { %270 = vmatpush3.msra.mxu0 %v26_v13  ;;  %295 = vmatpush3.msra.mxu1 %v114_v25 }
  0x1b   :  { %271 = vmatprep.subr.mxu0 %v328_v1 }
  0x1c   :  { %272 = vmatpush3.msra.mxu0 %v25_v14 }
  0x1d   :  { %273 = vmatprep.subr.mxu0 %v328_v1 }
  0x1e   :  { %274 = vmatpush3.msra.mxu0 %v24_v15 }
  0x1f   :  { %275 = vmatprep.subr.mxu0 %v328_v1 }
  0x20   :  { %276 = vmatpush3.msra.mxu0 %v23_v16 }
  0x21   :  { %278 = vmatmul.mubr.f32.vlgmr.msra.gmra.mxu0 %v22_v17 }
  0xe1   :  { %v106_v27 = vpop.f32.mrf.mxu0 }
  0xe2   :  { %v107_v28 = vadd.f32 %v106_v27, %v39_v26 }
  0xe3   :  { %v279_v29 = vpop.f32.mrf.mxu0 }
  0xe4   :  { %v110_v30 = vmul.f32 0.5, %v107_v28 }
  0xe6   :  { %302 = vtanh.f32 %v110_v30 }
  0xf3   :  { %v303_v31 = vpop.eup %302 }
  0xf4   :  { %v112_v32 = vmul.f32 0.5, %v303_v31 }
  0xf6   :  { %v113_v33 = vadd.f32 0.5, %v112_v32 }
  0xf8   :  { %297 = vmatmul.mubr.msk.f32.vlgmr.msra.gmra.mxu1 %vm124_vm1, %v113_v33 }
 0x1b8   :  { %v194_v35 = vpop.f32.mrf.mxu1 }
 0x1b9   :  { %v195_v36 = vadd.f32 %v194_v35, %v123_v34 }
 0x1ba   :  { %v298_v37 = vpop.f32.mrf.mxu1 }
 0x1bb   :  { %v198_v38 = vmul.f32 0.5, %v195_v36 }
 0x1bd   :  { %304 = vtanh.f32 %v198_v38 }
 0x1ca   :  { %v305_v39 = vpop.eup %304 }
 0x1cb   :  { %v200_v40 = vmul.f32 0.5, %v305_v39 }
 0x1cd   :  { %v201_v41 = vadd.f32 0.5, %v200_v40 }
 0x1cf   :  { %203 = vst.msk [vmem:[#allocation3] sm:$0x1] %vm202_vm2, %v201_v41 }
 0x1d0   :  { %317 = shalt.err (!%p314_p4)
}
 0x1d1   :  { %213 = dma.vmem_to_hbm [thread:$0]  %s211_s2, 16, %s476_s5, [#allocation4]  }
 0x1d2   :  { %326 = dma.done.wait [#allocation4], 16  }
 0x1d3   :  { %327 = vsyncadd [#allocation4], 4294967280 }
 0x1d4   :  { %217 = vsyncpa [#allocation4], 1 }

</bundles_post_ra>
